<compile_context>
chip_gen: v5e
topology: v5e:2x2
jax: 0.10.0
libtpu: 0.0.40
codegen_flags: <defaults>
</compile_context>

<pallas_src>
import jax
import jax.numpy as jnp
from jax.experimental import pallas as pl
from jax.experimental.pallas import tpu as pltpu


def _logreg_kernel(x_ref, w_ref, b_ref, o_ref):
    x = x_ref[...]                       # [TB, D]  current batch tile (VMEM)
    w = w_ref[...]                       # [1, D]   weight, VMEM-resident
    b = b_ref[0]                         # scalar bias from SMEM

    # Lane-dense matvec: (1, D) contracted with (TB, D) on D -> (1, TB).
    # Same dot_general pattern as q @ k.T; result lands lane-major so the
    # store below is an unmasked, lane-dense vst.
    z = jax.lax.dot_general(
        w, x,
        dimension_numbers=(((1,), (1,)), ((), ())),
        preferred_element_type=jnp.float32,
    ) + b                                # [1, TB]

    # sigmoid(z) = 1 / (1 + exp(-z)); exp and approx-reciprocal both run on
    # the otherwise-idle EUP slot, keeping the VALU free.
    e = jnp.exp(-z)
    sig = pl.reciprocal(1.0 + e, approx=True)

    o_ref[...] = sig.astype(o_ref.dtype)[None]   # [1, 1, TB]


def _choose_tile_b(B, D):
    """Pick a batch-tile size TB (rows per grid step)."""
    # Small batches: one tile covering the 8-row-aligned batch (no pointless
    # padding of a tiny problem up to 128 rows).
    b8 = max(8, ((B + 7) // 8) * 8)
    if b8 <= 256:
        return b8
    # Large batches: biggest lane-aligned (multiple of 128) tile whose two
    # double-buffered x copies stay within ~8 MiB of VMEM.  VMEM rows are
    # lane-padded, so use ceil(D/128)*128 for the footprint estimate.  Fits
    # the default scoped-VMEM limits on v5e/v6e and leaves ample headroom on
    # v7x (64 MiB physical VMEM) -- no vmem_limit_bytes override needed.
    budget_bytes = 8 * 1024 * 1024
    d_padded = max(128, ((D + 127) // 128) * 128)
    tb = budget_bytes // (2 * d_padded * 4)
    tb = (tb // 128) * 128
    tb = min(tb, 2048, ((B + 127) // 128) * 128)
    return int(max(128, tb))


def logistic_regression_forward(x, weight, bias, *, tile_b=None):
    """x: [B, D] f32; weight: [1, D] f32 (PyTorch nn.Linear layout); bias: [1] f32.

    Returns sigmoid(x @ weight.T + bias) with shape [B, 1].
    """
    B, D = x.shape
    assert weight.shape == (1, D)

    tb = tile_b if tile_b is not None else _choose_tile_b(B, D)
    nt = pl.cdiv(B, tb)                  # ragged last tile handled by Pallas
    Bp = nt * tb

    b = bias.reshape(1).astype(jnp.float32)   # scalar bias -> SMEM

    out3 = pl.pallas_call(
        _logreg_kernel,
        out_shape=jax.ShapeDtypeStruct((nt, 1, tb), x.dtype),
        grid=(nt,),
        in_specs=[
            # x: one (TB, D) tile per grid step -> auto double-buffered DMA.
            pl.BlockSpec((tb, D), lambda i: (i, 0)),
            # weight: constant index map -> stays resident in VMEM.
            pl.BlockSpec((1, D), lambda i: (0, 0)),
            # bias: scalar in SMEM.
            pl.BlockSpec(memory_space=pltpu.SMEM),
        ],
        # Lane-dense output block (1, 1, TB): unmasked vector stores.
        out_specs=pl.BlockSpec((1, 1, tb), lambda i: (i, 0, 0)),
        compiler_params=pltpu.CompilerParams(
            dimension_semantics=("parallel",),   # shard across v7x's 2 TCs
        ),
    )(x, weight, b)

    # (nt, 1, TB) row-major == batch order (last tile padded with garbage
    # rows); reshape is free, then drop anything past B.
    return out3.reshape(Bp, 1)[:B]


if __name__ == "__main__":
    input_dim = 3

    key = jax.random.PRNGKey(0)
    kx, kw, kb, kx2 = jax.random.split(key, 4)

    # Deterministic parameters mimicking nn.Linear(input_dim, 1) shapes:
    # weight: [1, input_dim], bias: [1]
    bound = 1.0 / (input_dim ** 0.5)
    weight = jax.random.uniform(kw, (1, input_dim), jnp.float32, -bound, bound)
    bias = jax.random.uniform(kb, (1,), jnp.float32, -bound, bound)

    # Small, module-consistent shape (batch=8, input_dim=3).
    x_small = jax.random.normal(kx, (8, input_dim), jnp.float32)
    out_small = jax.block_until_ready(
        logistic_regression_forward(x_small, weight, bias))
    ref_small = jax.nn.sigmoid(x_small @ weight.T + bias)
    assert out_small.shape == (8, 1)
    assert jnp.allclose(out_small, ref_small, atol=2e-3, rtol=2e-3)

    # Larger batch exercising the multi-tile, pipelined, lane-dense path with
    # a ragged final tile (TB=2048 -> 2 grid steps, no host-side padding).
    x_big = jax.random.normal(kx2, (3000, input_dim), jnp.float32)
    out_big = jax.block_until_ready(
        logistic_regression_forward(x_big, weight, bias))
    ref_big = jax.nn.sigmoid(x_big @ weight.T + bias)
    assert out_big.shape == (3000, 1)
    assert jnp.allclose(out_big, ref_big, atol=2e-3, rtol=2e-3)

    print("KERNEL_OK")
</pallas_src>

<mosaic_0001>
module attributes {stable_mosaic.version = 11 : i64} {
  func.func @_logreg_kernel(%arg0: i32, %arg1: memref<8x3xf32, #tpu.memory_space<vmem>>, %arg2: memref<1x3xf32, #tpu.memory_space<vmem>>, %arg3: memref<1xf32, #tpu.memory_space<smem>>, %arg4: memref<1x1x8xf32, #tpu.memory_space<vmem>>) attributes {dimension_semantics = [#tpu.dimension_semantics<parallel>], iteration_bounds = array<i64: 1>, scalar_prefetch = 0 : i64, scratch_operands = 0 : i64, tpu.core_type = #tpu.core_type<tc>, window_params = [{transform_indices = @transform_0, window_bounds = array<i64: 8, 3>}, {pipeline_mode = #tpu.pipeline_mode<synchronous>, transform_indices = @transform_1, window_bounds = array<i64: 1, 3>}, {transform_indices = @transform_2, window_bounds = array<i64: 1>}, {transform_indices = @transform_3, window_bounds = array<i64: 1, 1, 8>}]} {
    %c0 = arith.constant 0 : index
    %c0_0 = arith.constant 0 : index
    %0 = vector.load %arg1[%c0, %c0_0] : memref<8x3xf32, #tpu.memory_space<vmem>>, vector<8x3xf32>
    %c0_1 = arith.constant 0 : index
    %c0_2 = arith.constant 0 : index
    %1 = vector.load %arg2[%c0_1, %c0_2] : memref<1x3xf32, #tpu.memory_space<vmem>>, vector<1x3xf32>
    %c0_3 = arith.constant 0 : index
    %2 = memref.load %arg3[%c0_3] : memref<1xf32, #tpu.memory_space<smem>>
    %cst = arith.constant dense<0.000000e+00> : vector<1x8xf32>
    %3 = tpu.matmul %1, %0, %cst {dimension_numbers = #tpu.dot_dimension_numbers<[1], [1], [0], [0], [0, 0, 1, 0], [], []>} : vector<1x3xf32>, vector<8x3xf32>, vector<1x8xf32> -> vector<1x8xf32>
    %4 = vector.broadcast %2 : f32 to vector<1x8xf32>
    %5 = arith.addf %3, %4 : vector<1x8xf32>
    %cst_4 = arith.constant 0.000000e+00 : f32
    %6 = vector.broadcast %cst_4 : f32 to vector<1x8xf32>
    %7 = arith.subf %6, %5 : vector<1x8xf32>
    %8 = math.exp %7 : vector<1x8xf32>
    %cst_5 = arith.constant 1.000000e+00 : f32
    %9 = vector.broadcast %cst_5 : f32 to vector<1x8xf32>
    %10 = arith.addf %9, %8 : vector<1x8xf32>
    %11 = tpu.reciprocal %10 {approx = true} : vector<1x8xf32> -> vector<1x8xf32>
    %12 = vector.shape_cast %11 : vector<1x8xf32> to vector<1x1x8xf32>
    %c0_6 = arith.constant 0 : index
    %c0_7 = arith.constant 0 : index
    %c0_8 = arith.constant 0 : index
    %13 = vector.load %arg4[%c0_6, %c0_7, %c0_8] : memref<1x1x8xf32, #tpu.memory_space<vmem>>, vector<1x1x8xf32>
    tpu.vector_store %arg4[%c0_6, %c0_7, %c0_8], %12 {strides = array<i32>} : memref<1x1x8xf32, #tpu.memory_space<vmem>>, vector<1x1x8xf32>,
    return
  }
  func.func @transform_0(%arg0: i32) -> (i32, i32) {
    %c0_i32 = arith.constant 0 : i32
    %c0_i32_0 = arith.constant 0 : i32
    return %arg0, %c0_i32 : i32, i32
  }
  func.func @transform_1(%arg0: i32) -> (i32, i32) {
    %c0_i32 = arith.constant 0 : i32
    %c0_i32_0 = arith.constant 0 : i32
    %c0_i32_1 = arith.constant 0 : i32
    return %c0_i32, %c0_i32_0 : i32, i32
  }
  func.func @transform_2(%arg0: i32) -> i32 {
    %c0_i32 = arith.constant 0 : i32
    %c0_i32_0 = arith.constant 0 : i32
    return %c0_i32 : i32
  }
  func.func @transform_3(%arg0: i32) -> (i32, i32, i32) {
    %c0_i32 = arith.constant 0 : i32
    %c0_i32_0 = arith.constant 0 : i32
    %c0_i32_1 = arith.constant 0 : i32
    return %arg0, %c0_i32, %c0_i32_0 : i32, i32, i32
  }
}

</mosaic_0001>

<bundles_post_ra>
// kernel: tpu_custom_call.1
= control target key start
LH: loop header
LB: loop body
LE: loop exit
PB: predicated region body
PF: predicated region fallthrough
CT: control target
= control target key end

     0   :  { %vm20_vm0 = vcmask 23552   ;;  %s136_s0 = inlined_call_operand.vmem [shape: f32[8,3], index: 0, kind: input, shape index: {}]   ;;  %s137_s1 = inlined_call_operand.vmem [shape: f32[1,3], index: 1, kind: input, shape index: {}]   ;;  %s138_s2 = inlined_call_operand.<no memory space> [shape: f32[1], index: 2, kind: input, shape index: {}]   ;;  %s139_s3 = inlined_call_operand.hbm [shape: f32[1,1,8], index: 3, kind: output, shape index: {}]  }
   0x1   :  { %v16_v0 = vld [vmem:[%s136_s0] sm:$0xff] }
   0x2   :  { %9 = vsyncpa [#allocation4], 0  ;;  %70 = vmatpush.xpose.msk.msra.mxu0 %vm20_vm0, %v16_v0  ;;  %v17_v1 = vld [vmem:[%s137_s1] sm:$0x1]  ;;  %v19_v2 = vstv %s138_s2  ;;  %s103_s0 = smov [#allocation3]   ;;  %s61_s21 = sshll.u32 %s139_s3, 4  ;;  %s62_s21 = int_to_ptr.hbm [resolvable:$true] %s61_s21 }
   0x3   :  { %s59_s18 = sshll.u32 %s103_s0, 4  ;;  %vm52_vm1 = vcmask 57344   ;;  %s60_s18 = int_to_ptr.vmem [resolvable:$true] %s59_s18 }
   0x5   :  { %71 = vmatmul.msk.f32.vlgmr.msra.gmra.mxu0 %vm20_vm0, %v17_v1 }
  0x82   :  { %v44_v3 = vpop.f32.mrf.mxu0 }
  0x83   :  { %v45_v4 = vadd.f32 %v44_v3, %v19_v2 }
  0x85   :  { %v47_v5 = vsub.f32 0.0, %v45_v4 }
  0x87   :  { %v48_v6 = vmul.f32 1.442695, %v47_v5 }
  0x89   :  { %73 = vpow2.f32 %v48_v6 }
  0x8f   :  { %v74_v7 = vpop.eup %73 }
  0x90   :  { %v50_v8 = vadd.f32 1.0, %v74_v7 }
  0x92   :  { %75 = vrcp.f32 %v50_v8 }
  0x98   :  { %v76_v9 = vpop.eup %75 }
  0x99   :  { %53 = vst.msk [vmem:[#allocation3] sm:$0x1] %vm52_vm1, %v76_v9 }
  0x9a   :  { %64 = dma.vmem_to_hbm [thread:$0]  %s60_s18, 16, %s62_s21, [#allocation4]  }
  0x9b   :  { %101 = dma.done.wait [#allocation4], 16  }
  0x9c   :  { %102 = vsyncadd [#allocation4], 4294967280 }
  0x9d   :  { %69 = vsyncpa [#allocation4], 1 }

</bundles_post_ra>
